<compile_context>
chip_gen: v7x
topology: tpu7x:2x2x1
jax: 0.10.0
libtpu: 0.0.40
codegen_flags: <defaults>
</compile_context>

<pallas_src>
import jax
import jax.numpy as jnp
from jax import lax
from jax.experimental import pallas as pl
from jax.experimental.pallas import tpu as pltpu


def _round_up(x: int, m: int) -> int:
    return ((x + m - 1) // m) * m


def _make_kernel(*, TM, HW, inv_hw):
    """Fused conv(as matmul) + bias + ReLU + masked global-sum kernel."""

    def kernel(p_ref, w_ref, b_ref, out_ref):
        # p_ref  : (1, TM, K_pad)     bf16  im2col patches for this (batch, tile)
        # w_ref  : (K_pad, Cout_pad)  bf16  conv weight, rows ordered (kh, kw, cin)
        # b_ref  : (1, Cout_pad)      f32   conv bias (zero in padded channels)
        # out_ref: (1, 1, Cout_pad)   f32   pooled features; resident across t
        t = pl.program_id(1)

        @pl.when(t == 0)
        def _():
            out_ref[...] = jnp.zeros_like(out_ref)

        # Conv as one MXU matmul (bf16 in, f32 accumulate) + bias + ReLU (f32).
        acc = jnp.dot(p_ref[0], w_ref[...],
                      preferred_element_type=jnp.float32)        # (TM, Cout_pad)
        acc = jnp.maximum(acc + b_ref[...], 0.0)

        # Global-sum over spatial positions as an MXU reduction.  Rows past
        # H*W are zero-padded patches whose ReLU output is relu(bias) != 0,
        # so mask them with an in-kernel binary iota mask (no HBM mask buffer).
        q = t * TM + lax.broadcasted_iota(jnp.int32, (1, TM), 1)
        mask = (q < HW).astype(jnp.float32)                      # (1, TM)
        out_ref[0] = out_ref[0] + jnp.dot(
            mask, acc, preferred_element_type=jnp.float32)       # (1, Cout_pad)

        # Convert the accumulated sum into the mean on the final spatial tile.
        @pl.when(t == pl.num_programs(1) - 1)
        def _():
            out_ref[...] = out_ref[...] * inv_hw

    return kernel


def cv_model_forward(x_nchw, conv_w, conv_b, head_w, head_b, *, q_tile=256):
    """conv3x3(pad=1) + ReLU -> global avg pool (Pallas) -> linear head (XLA)."""
    B, Cin, H, W = x_nchw.shape
    Cout = conv_w.shape[0]
    HW = H * W

    K = 9 * Cin
    K_pad = _round_up(K, 32)            # sublane-friendly, lane-dense patch width
    Cout_pad = _round_up(Cout, 128)     # lane-dense MXU columns / stores

    TM = min(_round_up(q_tile, 8), _round_up(HW, 8))
    NT = pl.cdiv(HW, TM)
    Mq_pad = NT * TM

    # ---- host-side lane-dense im2col (cheap for small Cin; K_pad is tiny) ----
    x_nhwc = jnp.transpose(x_nchw, (0, 2, 3, 1))
    xp = jnp.pad(x_nhwc, ((0, 0), (1, 1), (1, 1), (0, 0)))
    taps = [xp[:, kh:kh + H, kw:kw + W, :] for kh in range(3) for kw in range(3)]
    patches = jnp.concatenate(taps, axis=-1).reshape(B, HW, K)   # K = (kh, kw, cin)
    patches = jnp.pad(patches, ((0, 0), (0, Mq_pad - HW), (0, K_pad - K)))
    patches = patches.astype(jnp.bfloat16)

    # Conv weight -> (K, Cout), K ordered (kh, kw, cin) to match the patches.
    w_mat = jnp.transpose(conv_w, (2, 3, 1, 0)).reshape(K, Cout)
    w_mat = jnp.pad(w_mat, ((0, K_pad - K), (0, Cout_pad - Cout))).astype(jnp.bfloat16)
    b_vec = jnp.pad(conv_b, (0, Cout_pad - Cout)).reshape(1, Cout_pad).astype(jnp.float32)

    kernel = _make_kernel(TM=TM, HW=HW, inv_hw=1.0 / float(HW))

    flops = 2 * B * Mq_pad * K_pad * Cout_pad + 2 * B * Mq_pad * Cout_pad
    bytes_accessed = int(patches.size * 2 + w_mat.size * 2 + b_vec.size * 4
                         + B * Cout_pad * 4)

    pooled = pl.pallas_call(
        kernel,
        out_shape=jax.ShapeDtypeStruct((B, 1, Cout_pad), jnp.float32),
        grid=(B, NT),
        in_specs=[
            pl.BlockSpec((1, TM, K_pad), lambda b, t: (b, t, 0)),      # patches (bf16)
            pl.BlockSpec((K_pad, Cout_pad), lambda b, t: (0, 0)),      # conv W (bf16)
            pl.BlockSpec((1, Cout_pad), lambda b, t: (0, 0)),          # conv b (f32)
        ],
        out_specs=pl.BlockSpec((1, 1, Cout_pad), lambda b, t: (b, 0, 0)),
        compiler_params=pltpu.CompilerParams(
            # batch is independent; spatial tiles accumulate into the pooled block
            dimension_semantics=("parallel", "arbitrary"),
        ),
        cost_estimate=pl.CostEstimate(
            flops=flops, transcendentals=0, bytes_accessed=bytes_accessed),
    )(patches, w_mat, b_vec)

    pooled = pooled[:, 0, :Cout]                                       # (B, Cmid) f32

    # Linear head hoisted to XLA (tiny GEMM; keeping it in-kernel was pure drain).
    return pooled @ head_w.T.astype(jnp.float32) + head_b.astype(jnp.float32)


def reference_forward(x_nchw, conv_w, conv_b, head_w, head_b):
    """Pure-JAX f32 reference for a sanity check."""
    y = lax.conv_general_dilated(
        x_nchw, conv_w, window_strides=(1, 1), padding="SAME",
        dimension_numbers=("NCHW", "OIHW", "NCHW"))
    y = jnp.maximum(y + conv_b[None, :, None, None], 0.0)
    pooled = jnp.mean(y, axis=(2, 3))
    return pooled @ head_w.T + head_b


if __name__ == "__main__":
    # Small shapes consistent with an image-classification forward pass.
    B, Cin, H, W = 2, 3, 16, 16
    Cmid = 32
    num_classes = 10

    key = jax.random.PRNGKey(0)
    k1, k2, k3, k4, k5 = jax.random.split(key, 5)

    x = jax.random.normal(k1, (B, Cin, H, W), dtype=jnp.float32)
    conv_w = jax.random.normal(k2, (Cmid, Cin, 3, 3), dtype=jnp.float32) * 0.1
    conv_b = jax.random.normal(k3, (Cmid,), dtype=jnp.float32) * 0.1
    head_w = jax.random.normal(k4, (num_classes, Cmid), dtype=jnp.float32) * 0.1
    head_b = jax.random.normal(k5, (num_classes,), dtype=jnp.float32) * 0.1

    logits = cv_model_forward(x, conv_w, conv_b, head_w, head_b)
    logits = jax.block_until_ready(logits)

    ref = reference_forward(x, conv_w, conv_b, head_w, head_b)
    assert logits.shape == (B, num_classes)
    # bf16 MXU operands -> relaxed tolerance vs the f32 reference.
    assert jnp.allclose(logits, ref, atol=2e-2, rtol=2e-2), "mismatch vs reference"

    print("KERNEL_OK")
</pallas_src>

<mosaic_0001>
module attributes {stable_mosaic.version = 11 : i64} {
  func.func @kernel(%arg0: i32, %arg1: i32, %arg2: memref<1x256x32xbf16, #tpu.memory_space<vmem>>, %arg3: memref<32x128xbf16, #tpu.memory_space<vmem>>, %arg4: memref<1x128xf32, #tpu.memory_space<vmem>>, %arg5: memref<1x1x128xf32, #tpu.memory_space<vmem>>) attributes {dimension_semantics = [#tpu.dimension_semantics<parallel>, #tpu.dimension_semantics<arbitrary>], iteration_bounds = array<i64: 2, 1>, scalar_prefetch = 0 : i64, scratch_operands = 0 : i64, tpu.core_type = #tpu.core_type<tc>, window_params = [{transform_indices = @transform_0, window_bounds = array<i64: 1, 256, 32>}, {pipeline_mode = #tpu.pipeline_mode<synchronous>, transform_indices = @transform_1, window_bounds = array<i64: 32, 128>}, {pipeline_mode = #tpu.pipeline_mode<synchronous>, transform_indices = @transform_2, window_bounds = array<i64: 1, 128>}, {transform_indices = @transform_3, window_bounds = array<i64: 1, 1, 128>}]} {
    %c0_i32 = arith.constant 0 : i32
    %0 = arith.cmpi eq, %arg1, %c0_i32 : i32
    %1 = arith.extui %0 : i1 to i32
    %c0_i32_0 = arith.constant 0 : i32
    %2 = arith.cmpi ne, %1, %c0_i32_0 : i32
    scf.if %2 {
      %cst_18 = arith.constant 0.000000e+00 : f32
      %30 = vector.broadcast %cst_18 : f32 to vector<1x1x128xf32>
      %c0_19 = arith.constant 0 : index
      %c0_20 = arith.constant 0 : index
      %c0_21 = arith.constant 0 : index
      %31 = vector.load %arg5[%c0_19, %c0_20, %c0_21] : memref<1x1x128xf32, #tpu.memory_space<vmem>>, vector<1x1x128xf32>
      tpu.vector_store %arg5[%c0_19, %c0_20, %c0_21], %30 {strides = array<i32>} : memref<1x1x128xf32, #tpu.memory_space<vmem>>, vector<1x1x128xf32>,
    } else {
    }
    %c0 = arith.constant 0 : index
    %c0_1 = arith.constant 0 : index
    %c0_2 = arith.constant 0 : index
    %3 = vector.load %arg2[%c0, %c0_1, %c0_2] : memref<1x256x32xbf16, #tpu.memory_space<vmem>>, vector<1x256x32xbf16>
    %4 = vector.shape_cast %3 : vector<1x256x32xbf16> to vector<256x32xbf16>
    %c0_3 = arith.constant 0 : index
    %c0_4 = arith.constant 0 : index
    %5 = vector.load %arg3[%c0_3, %c0_4] : memref<32x128xbf16, #tpu.memory_space<vmem>>, vector<32x128xbf16>
    %cst = arith.constant dense<0.000000e+00> : vector<256x128xf32>
    %6 = tpu.matmul %4, %5, %cst {dimension_numbers = #tpu.dot_dimension_numbers<[1], [0], [0], [1], [0, 0, 1, 1], [], []>} : vector<256x32xbf16>, vector<32x128xbf16>, vector<256x128xf32> -> vector<256x128xf32>
    %c0_5 = arith.constant 0 : index
    %c0_6 = arith.constant 0 : index
    %7 = vector.load %arg4[%c0_5, %c0_6] : memref<1x128xf32, #tpu.memory_space<vmem>>, vector<1x128xf32>
    %8 = vector.broadcast %7 : vector<1x128xf32> to vector<256x128xf32>
    %9 = arith.addf %6, %8 : vector<256x128xf32>
    %cst_7 = arith.constant 0.000000e+00 : f32
    %10 = vector.broadcast %cst_7 : f32 to vector<256x128xf32>
    %11 = arith.maximumf %9, %10 : vector<256x128xf32>
    %c256_i32 = arith.constant 256 : i32
    %12 = arith.muli %arg1, %c256_i32 : i32
    %13 = tpu.iota {dimensions = array<i32: 1>} : vector<1x256xi32>
    %14 = vector.broadcast %12 : i32 to vector<1x256xi32>
    %15 = arith.addi %14, %13 : vector<1x256xi32>
    %c256_i32_8 = arith.constant 256 : i32
    %16 = vector.broadcast %c256_i32_8 : i32 to vector<1x256xi32>
    %17 = arith.cmpi slt, %15, %16 : vector<1x256xi32>
    %18 = arith.extui %17 : vector<1x256xi1> to vector<1x256xi32>
    %19 = arith.sitofp %18 : vector<1x256xi32> to vector<1x256xf32>
    %c0_9 = arith.constant 0 : index
    %c0_10 = arith.constant 0 : index
    %c0_11 = arith.constant 0 : index
    %20 = vector.load %arg5[%c0_9, %c0_10, %c0_11] : memref<1x1x128xf32, #tpu.memory_space<vmem>>, vector<1x1x128xf32>
    %21 = vector.shape_cast %20 : vector<1x1x128xf32> to vector<1x128xf32>
    %cst_12 = arith.constant dense<0.000000e+00> : vector<1x128xf32>
    %22 = tpu.matmul %19, %11, %cst_12 {dimension_numbers = #tpu.dot_dimension_numbers<[1], [0], [0], [1], [0, 0, 1, 1], [], []>} : vector<1x256xf32>, vector<256x128xf32>, vector<1x128xf32> -> vector<1x128xf32>
    %23 = arith.addf %21, %22 : vector<1x128xf32>
    %c0_13 = arith.constant 0 : index
    %c0_14 = arith.constant 0 : index
    %c0_15 = arith.constant 0 : index
    %24 = vector.load %arg5[%c0_13, %c0_14, %c0_15] : memref<1x1x128xf32, #tpu.memory_space<vmem>>, vector<1x1x128xf32>
    %25 = vector.shape_cast %24 : vector<1x1x128xf32> to vector<1x128xf32>
    %26 = vector.shape_cast %23 : vector<1x128xf32> to vector<1x1x128xf32>
    tpu.vector_store %arg5[%c0_13, %c0_14, %c0_15], %26 {strides = array<i32>} : memref<1x1x128xf32, #tpu.memory_space<vmem>>, vector<1x1x128xf32>,
    %c0_i32_16 = arith.constant 0 : i32
    %27 = arith.cmpi eq, %arg1, %c0_i32_16 : i32
    %28 = arith.extui %27 : i1 to i32
    %c0_i32_17 = arith.constant 0 : i32
    %29 = arith.cmpi ne, %28, %c0_i32_17 : i32
    scf.if %29 {
      %c0_18 = arith.constant 0 : index
      %c0_19 = arith.constant 0 : index
      %c0_20 = arith.constant 0 : index
      %30 = vector.load %arg5[%c0_18, %c0_19, %c0_20] : memref<1x1x128xf32, #tpu.memory_space<vmem>>, vector<1x1x128xf32>
      %cst_21 = arith.constant 3.906250e-03 : f32
      %31 = vector.broadcast %cst_21 : f32 to vector<1x1x128xf32>
      %32 = arith.mulf %30, %31 : vector<1x1x128xf32>
      %c0_22 = arith.constant 0 : index
      %c0_23 = arith.constant 0 : index
      %c0_24 = arith.constant 0 : index
      %33 = vector.load %arg5[%c0_22, %c0_23, %c0_24] : memref<1x1x128xf32, #tpu.memory_space<vmem>>, vector<1x1x128xf32>
      tpu.vector_store %arg5[%c0_22, %c0_23, %c0_24], %32 {strides = array<i32>} : memref<1x1x128xf32, #tpu.memory_space<vmem>>, vector<1x1x128xf32>,
    } else {
    }
    return
  }
  func.func @transform_0(%arg0: i32, %arg1: i32) -> (i32, i32, i32) {
    %c0_i32 = arith.constant 0 : i32
    %c0_i32_0 = arith.constant 0 : i32
    return %arg0, %arg1, %c0_i32 : i32, i32, i32
  }
  func.func @transform_1(%arg0: i32, %arg1: i32) -> (i32, i32) {
    %c0_i32 = arith.constant 0 : i32
    %c0_i32_0 = arith.constant 0 : i32
    %c0_i32_1 = arith.constant 0 : i32
    return %c0_i32, %c0_i32_0 : i32, i32
  }
  func.func @transform_2(%arg0: i32, %arg1: i32) -> (i32, i32) {
    %c0_i32 = arith.constant 0 : i32
    %c0_i32_0 = arith.constant 0 : i32
    %c0_i32_1 = arith.constant 0 : i32
    return %c0_i32, %c0_i32_0 : i32, i32
  }
  func.func @transform_3(%arg0: i32, %arg1: i32) -> (i32, i32, i32) {
    %c0_i32 = arith.constant 0 : i32
    %c0_i32_0 = arith.constant 0 : i32
    %c0_i32_1 = arith.constant 0 : i32
    return %arg0, %c0_i32, %c0_i32_0 : i32, i32, i32
  }
}

</mosaic_0001>

<bundles_post_ra>
// kernel: tpu_custom_call.1
= control target key start
LH: loop header
LB: loop body
LE: loop exit
PB: predicated region body
PF: predicated region fallthrough
CT: control target
= control target key end

     0   :  { %8 = vsyncpa [#allocation3], 0  ;;  %s1293_s0 = inlined_call_operand.vmem [shape: bf16[2,256,32], index: 0, kind: input, shape index: {}]   ;;  %s1294_s1 = inlined_call_operand.vmem [shape: bf16[32,128], index: 1, kind: input, shape index: {}]   ;;  %s1295_s2 = inlined_call_operand.vmem [shape: f32[1,128], index: 2, kind: input, shape index: {}]   ;;  %s1296_s3 = inlined_call_operand.hbm [shape: f32[2,1,128], index: 3, kind: output, shape index: {}]  }
   0x1   :  { %10 = vsyncpa [#allocation3 + $0x1], 0  ;;  %s1102_s12 = smov 0   ;;  %s1104_s13 = smov 0  }
   0x2   :  { %s1106_s14 = smov 0   ;;  %s1108_s15 = smov 0  }
   0x3   :  { %s1110_s16 = smov 0   ;;  %s1112_s17 = smov 0  }
   0x4 LB: > { %s753_s18 = sadd.s32 4294967295, %s1077_s17   ;;  %s754_s19 = sadd.s32 4294967294, %s1077_s17   ;;  %s1077_s17 = sphi %s1112_s17, %s16_s17   ;;  %s1073_s16 = sphi %s1110_s16, %s1303_s16   ;;  %s1069_s15 = sphi %s1108_s15, %s1302_s15   ;;  %s1065_s14 = sphi %s1106_s14, %s1301_s14   ;;  %s1061_s13 = sphi %s1104_s13, %s1300_s13   ;;  %s1057_s12 = sphi %s1102_s12, %s1299_s12  }
   0x5   : > { %s28_s20 = sadd.s32 1, %s1073_s16  ;;  %s105_s21 = sadd.s32 1, %s1065_s14 }
   0x6   : > { %p30_p0 = scmp.ge.s32.totalorder %s28_s20, 2  ;;  %p115_p1 = scmp.ne.s32.totalorder %s1065_s14, %s1061_s13 }
   0x7   : > { %p116_p2 = scmp.eq.s32.totalorder %s753_s18, 1  ;;  %p121_p3 = scmp.ne.s32.totalorder %s1061_s13, %s1057_s12 }
   0x8   : > { %s1305_s20 = smov (%p30_p0, %s28_s20), 0  ;;  %p122_p5 = scmp.eq.s32.totalorder %s754_s19, 1 }
   0x9   : > { %p1142_p4 = por %p116_p2, %p115_p1  ;;  %s102_s23 = ssub.s32 %s1073_s16, %s1305_s20 }
   0xa   : > { %p757_p6 = scmp.ge.s32.totalorder %s1077_s17, 1  ;;  %p103_p7 = scmp.eq.s32.totalorder %s102_s23, 0 }
   0xb   : > { %p1149_p8 = por %p122_p5, %p121_p3  ;;  %p159_p9 = scmp.lt.s32.totalorder %s1077_s17, 3 }
   0xc   : > { %s1155_s25 = scalar_select %p103_p7, %s1065_s14, %s105_s21  }
   0xd   : > { %p160_p10 = pnand %p757_p6, %p159_p9 }
   0xe   : > { %v981_v0 = vld [vmem:[%s1294_s1] sm:$0xff] (!%p160_p10)   ;;  %p187_p11 = scmp.lt.s32.totalorder (!%p160_p10), %s1069_s15, 1  ;;  %v982_v1 = vld [vmem:[%s1294_s1 + $0x8] sm:$0xff] (!%p160_p10)   ;;  %vm337_vm0 = vcmask (!%p160_p10), 261120   ;;  %v1079_v18 = vmov (!%p160_p10), 1.0   ;;  %s184_s10 = sand.u32 (!%p160_p10), 1, %s1061_s13  }
   0xf   : > { %163 = sbr.rel (%p160_p10) target bundleno = 523 (0x20b), region = 32  ;;  %852 = vmatprep.subr.bf16.mxu0 (!%p160_p10), %v981_v0  ;;  %920 = vmatprep.subr.bf16.mxu1 (!%p160_p10), %v981_v0  ;;  %v1206_v19 = vld [vmem:[%s1295_s2] ss:$0 sm:$0xff] (!%p160_p10)  ;;  %s185_s11 = scalar_lea.vmem (!%p160_p10), [#allocation2], %s184_s10 }
  0x10   : > { %853 = vmatpush3.bf16.msra.mxu0 (!%p160_p10), %v981_v0  ;;  %922 = vmatpush3.bf16.msra.mxu1 (!%p160_p10), %v981_v0  ;;  %s795_s18 = sshll.u32 (!%p160_p10), %s1069_s15, 4  ;;  %s684_s19 = sshll.u32 (!%p160_p10), %s185_s11, 4  ;;  %s1248_s19 = int_to_ptr.vmem [resolvable:$true] %s684_s19 }
  0x11   : > { %854 = vmatprep.subr.bf16.mxu0 (!%p160_p10), %v982_v1  ;;  %921 = vmatprep.subr.bf16.mxu1 (!%p160_p10), %v982_v1  ;;  %s1246_s26 = scalar_lea.hbm (!%p160_p10), %s1296_s3, %s795_s18  ;;  %s672_s27 = scalar_lea.sflag (!%p160_p10), [#allocation3], %s184_s10 }
  0x12   : > { %s999_s28 = scalar_lea.vmem (!%p160_p10), %s1248_s19, 16 }
  0x13   : > { %p1000_p12 = scmp.ne.s32.totalorder (!%p160_p10), %s1248_s19, %s999_s28 }
  0x14   : > { %855 = vmatpush3.bf16.msra.mxu0 (!%p160_p10), %v982_v1  ;;  %923 = vmatpush3.bf16.msra.mxu1 (!%p160_p10), %v982_v1 }
  0x15   : > { %p1001_p13 = pnand (!%p160_p10), %p1000_p12, %p1142_p4 }
  0x16   : > { %s188_s30 = scalar_select %p187_p11, %s1069_s15, 1 }
  0x17   : > { %p1002_p0 = pneg %p1001_p13  ;;  %s1081_s15 = smov [#allocation2]  }
  0x18   : > { %s798_s4 = sshll.u32 %s188_s30, 7  ;;  %s1003_s29 = sshll.u32 %s1081_s15, 4  ;;  %s1004_s29 = int_to_ptr.vmem [resolvable:$false] %s1003_s29 }
  0x19   : > { %s1168_s7 = scalar_lea.vmem %s1293_s0, %s798_s4  ;;  %s1005_s30 = scalar_lea.vmem %s1004_s29, 32 }
  0x1a   : > { %v983_v2 = vld [vmem:[%s1168_s7] sm:$0xff]   ;;  %v985_v4 = vld [vmem:[%s1168_s7 + $0x8] sm:$0xff]   ;;  %v987_v6 = vld [vmem:[%s1168_s7 + $0x10] sm:$0xff]   ;;  %p1006_p1 = scmp.lt.s32.totalorder %s1248_s19, %s1004_s29  ;;  %p1007_p2 = scmp.lt.s32.totalorder %s1005_s30, %s999_s28 }
  0x1b   : > { %v984_v3 = vld [vmem:[%s1168_s7 + $0x40] sm:$0xff]   ;;  %856 = vmatprep.mubr.msk.bf16.mxu0 %vm337_vm0, %v983_v2  ;;  %v986_v5 = vld [vmem:[%s1168_s7 + $0x48] sm:$0xff]   ;;  %v988_v7 = vld [vmem:[%s1168_s7 + $0x50] sm:$0xff]  }
  0x1c   : > { %872 = vmatprep.mubr.msk.bf16.mxu1 %vm337_vm0, %v984_v3  ;;  %857 = vmatmul.mubr.msk.bf16.vlgmr.msra.gmra.mrb[0].mxu0 %vm337_vm0, %v985_v4  ;;  %v989_v8 = vld [vmem:[%s1168_s7 + $0x18] sm:$0xff]   ;;  %v991_v10 = vld [vmem:[%s1168_s7 + $0x20] sm:$0xff]   ;;  %v993_v12 = vld [vmem:[%s1168_s7 + $0x28] sm:$0xff]   ;;  %p1008_p3 = por %p1007_p2, %p1006_p1 }
  0x1d   : > { %873 = vmatmul.mubr.msk.bf16.vlgmr.msra.gmra.mrb[0].mxu1 %vm337_vm0, %v986_v5  ;;  %860 = vmatprep.mubr.msk.bf16.mxu0 %vm337_vm0, %v987_v6  ;;  %v990_v9 = vld [vmem:[%s1168_s7 + $0x58] sm:$0xff]   ;;  %v992_v11 = vld [vmem:[%s1168_s7 + $0x60] sm:$0xff]   ;;  %v994_v13 = vld [vmem:[%s1168_s7 + $0x68] sm:$0xff]  }
  0x1e   : > { %876 = vmatprep.mubr.msk.bf16.mxu1 %vm337_vm0, %v988_v7  ;;  %v995_v14 = vld [vmem:[%s1168_s7 + $0x30] sm:$0xff]   ;;  %v997_v16 = vld [vmem:[%s1168_s7 + $0x38] sm:$0xff]   ;;  %p1009_p5 = pnand %p1008_p3, %p1002_p0 }
  0x1f   : > { %v996_v15 = vld [vmem:[%s1168_s7 + $0x70] sm:$0xff]   ;;  %v998_v17 = vld [vmem:[%s1168_s7 + $0x78] sm:$0xff]  }
  0x24   : > { %861 = vmatmul.mubr.msk.bf16.gmra.mrb[4].mxu0 %vm337_vm0, %v989_v8 }
  0x25   : > { %877 = vmatmul.mubr.msk.bf16.gmra.mrb[4].mxu1 %vm337_vm0, %v990_v9  ;;  %864 = vmatprep.mubr.msk.bf16.mxu0 %vm337_vm0, %v991_v10 }
  0x26   : > { %880 = vmatprep.mubr.msk.bf16.mxu1 %vm337_vm0, %v992_v11 }
  0x2c   : > { %865 = vmatmul.mubr.msk.bf16.gmra.mrb[8].mxu0 %vm337_vm0, %v993_v12 }
  0x2d   : > { %881 = vmatmul.mubr.msk.bf16.gmra.mrb[8].mxu1 %vm337_vm0, %v994_v13  ;;  %868 = vmatprep.mubr.msk.bf16.mxu0 %vm337_vm0, %v995_v14 }
  0x2e   : > { %884 = vmatprep.mubr.msk.bf16.mxu1 %vm337_vm0, %v996_v15 }
  0x34   : > { %869 = vmatmul.mubr.msk.bf16.gmra.mrb[12].mxu0 %vm337_vm0, %v997_v16 }
  0x35   : > { %885 = vmatmul.mubr.msk.bf16.gmra.mrb[12].mxu1 %vm337_vm0, %v998_v17 }
  0x36   : > { %657 = vmatprep.mubr.f32.mxu1 %v1079_v18 }
  0xef   : > { %v858_v20 = vpop.f32.mrb[0].mxu0 }
  0xf0   : > { %v429_v21 = vadd.f32 %v858_v20, %v1206_v19  ;;  %v874_v22 = vpop.f32.mrb[0].mxu1  ;;  %v420_v23 = vpop.f32.mrb[1].mxu0 }
  0xf1   : > { %v493_v24 = vadd.f32 %v874_v22, %v1206_v19  ;;  %v421_v25 = vadd.f32 %v1206_v19, %v420_v23  ;;  %v484_v26 = vpop.f32.mrb[1].mxu1  ;;  %v859_v27 = vpop.f32.mrb[2].mxu0 }
  0xf2   : > { %v549_v28 = vmax.f32 %v429_v21, 0.0  ;;  %v485_v29 = vadd.f32 %v1206_v19, %v484_v26  ;;  %v432_v30 = vadd.f32 %v859_v27, %v1206_v19  ;;  %v875_v31 = vpop.f32.mrb[2].mxu1  ;;  %v423_v32 = vpop.f32.mrb[3].mxu0 }
  0xf3   : > { %v496_v33 = vadd.f32 %v875_v31, %v1206_v19  ;;  %v424_v34 = vadd.f32 %v1206_v19, %v423_v32  ;;  %v487_v35 = vpop.f32.mrb[3].mxu1  ;;  %v565_v38 = vmax.f32 %v493_v24, 0.0  ;;  %v547_v39 = vmax.f32 %v421_v25, 0.0 }
  0xf4   : > { %v550_v36 = vmax.f32 %v432_v30, 0.0  ;;  %v488_v37 = vadd.f32 %v1206_v19, %v487_v35  ;;  %v563_v42 = vmax.f32 %v485_v29, 0.0 }
  0xf5   : > { %v566_v40 = vmax.f32 %v496_v33, 0.0  ;;  %v548_v41 = vmax.f32 %v424_v34, 0.0 }
  0xf6   : > { %v894_v43 = vpack.c.bf16 %v550_v36, %v549_v28  ;;  %v564_v44 = vmax.f32 %v488_v37, 0.0 }
  0xf7   : > { %v892_v45 = vpack.c.bf16 %v566_v40, %v565_v38  ;;  %v890_v46 = vpack.c.bf16 %v548_v41, %v547_v39  ;;  %v862_v47 = vpop.f32.mrb[4].mxu0 }
  0xf8   : > { %v888_v48 = vpack.c.bf16 %v564_v44, %v563_v42  ;;  %v445_v49 = vadd.f32 %v862_v47, %v1206_v19  ;;  %v878_v50 = vpop.f32.mrb[4].mxu1  ;;  %v436_v51 = vpop.f32.mrb[5].mxu0 }
  0xf9   : > { %v509_v52 = vadd.f32 %v878_v50, %v1206_v19  ;;  %v437_v53 = vadd.f32 %v1206_v19, %v436_v51  ;;  %v500_v54 = vpop.f32.mrb[5].mxu1  ;;  %v863_v55 = vpop.f32.mrb[6].mxu0 }
  0xfa   : > { %v553_v56 = vmax.f32 %v445_v49, 0.0  ;;  %v501_v57 = vadd.f32 %v1206_v19, %v500_v54  ;;  %v448_v58 = vadd.f32 %v863_v55, %v1206_v19  ;;  %v879_v59 = vpop.f32.mrb[6].mxu1  ;;  %889 = vmatprep.subr.bf16.mxu1 %v888_v48  ;;  %v439_v60 = vpop.f32.mrb[7].mxu0 }
  0xfb   : > { %v512_v61 = vadd.f32 %v879_v59, %v1206_v19  ;;  %v440_v62 = vadd.f32 %v1206_v19, %v439_v60  ;;  %v503_v63 = vpop.f32.mrb[7].mxu1  ;;  %891 = vmatpush3.bf16.msra.mxu1 %v890_v46  ;;  %v569_v2 = vmax.f32 %v509_v52, 0.0  ;;  %v551_v3 = vmax.f32 %v437_v53, 0.0 }
  0xfc   : > { %v554_v0 = vmax.f32 %v448_v58, 0.0  ;;  %v504_v1 = vadd.f32 %v1206_v19, %v503_v63  ;;  %893 = vmatprep.subr.bf16.mxu1 %v892_v45  ;;  %v567_v6 = vmax.f32 %v501_v57, 0.0 }
  0xfd   : > { %v570_v4 = vmax.f32 %v512_v61, 0.0  ;;  %v552_v5 = vmax.f32 %v440_v62, 0.0 }
  0xfe   : > { %v902_v7 = vpack.c.bf16 %v554_v0, %v553_v56  ;;  %v568_v8 = vmax.f32 %v504_v1, 0.0 }
  0xff   : > { %v900_v9 = vpack.c.bf16 %v570_v4, %v569_v2  ;;  %v898_v10 = vpack.c.bf16 %v552_v5, %v551_v3  ;;  %895 = vmatpush3.bf16.msra.mxu1 %v894_v43  ;;  %v866_v11 = vpop.f32.mrb[8].mxu0 }
 0x100   : > { %v896_v12 = vpack.c.bf16 %v568_v8, %v567_v6  ;;  %v461_v13 = vadd.f32 %v866_v11, %v1206_v19  ;;  %v882_v14 = vpop.f32.mrb[8].mxu1  ;;  %v452_v15 = vpop.f32.mrb[9].mxu0 }
 0x101   : > { %v525_v16 = vadd.f32 %v882_v14, %v1206_v19  ;;  %v453_v17 = vadd.f32 %v1206_v19, %v452_v15  ;;  %v516_v20 = vpop.f32.mrb[9].mxu1  ;;  %v867_v21 = vpop.f32.mrb[10].mxu0 }
 0x102   : > { %v557_v22 = vmax.f32 %v461_v13, 0.0  ;;  %v517_v23 = vadd.f32 %v1206_v19, %v516_v20  ;;  %v464_v24 = vadd.f32 %v867_v21, %v1206_v19  ;;  %v883_v25 = vpop.f32.mrb[10].mxu1  ;;  %897 = vmatprep.subr.bf16.mxu1 %v896_v12  ;;  %v455_v26 = vpop.f32.mrb[11].mxu0 }
 0x103   : > { %v528_v27 = vadd.f32 %v883_v25, %v1206_v19  ;;  %v456_v28 = vadd.f32 %v1206_v19, %v455_v26  ;;  %v519_v29 = vpop.f32.mrb[11].mxu1  ;;  %899 = vmatpush3.bf16.msra.mxu1 %v898_v10  ;;  %v573_v32 = vmax.f32 %v525_v16, 0.0  ;;  %v555_v33 = vmax.f32 %v453_v17, 0.0 }
 0x104   : > { %v558_v30 = vmax.f32 %v464_v24, 0.0  ;;  %v520_v31 = vadd.f32 %v1206_v19, %v519_v29  ;;  %901 = vmatprep.subr.bf16.mxu1 %v900_v9  ;;  %v571_v36 = vmax.f32 %v517_v23, 0.0 }
 0x105   : > { %v574_v34 = vmax.f32 %v528_v27, 0.0  ;;  %v556_v35 = vmax.f32 %v456_v28, 0.0 }
 0x106   : > { %v910_v37 = vpack.c.bf16 %v558_v30, %v557_v22  ;;  %v572_v38 = vmax.f32 %v520_v31, 0.0 }
 0x107   : > { %v908_v39 = vpack.c.bf16 %v574_v34, %v573_v32  ;;  %v906_v40 = vpack.c.bf16 %v556_v35, %v555_v33  ;;  %903 = vmatpush3.bf16.msra.mxu1 %v902_v7  ;;  %v870_v41 = vpop.f32.mrb[12].mxu0 }
 0x108   : > { %v904_v42 = vpack.c.bf16 %v572_v38, %v571_v36  ;;  %v477_v43 = vadd.f32 %v870_v41, %v1206_v19  ;;  %v886_v44 = vpop.f32.mrb[12].mxu1  ;;  %v468_v45 = vpop.f32.mrb[13].mxu0 }
 0x109   : > { %v541_v46 = vadd.f32 %v886_v44, %v1206_v19  ;;  %v469_v47 = vadd.f32 %v1206_v19, %v468_v45  ;;  %v532_v48 = vpop.f32.mrb[13].mxu1  ;;  %v871_v49 = vpop.f32.mrb[14].mxu0 }
 0x10a   : > { %v561_v50 = vmax.f32 %v477_v43, 0.0  ;;  %v533_v51 = vadd.f32 %v1206_v19, %v532_v48  ;;  %v480_v52 = vadd.f32 %v871_v49, %v1206_v19  ;;  %v887_v53 = vpop.f32.mrb[14].mxu1  ;;  %905 = vmatprep.subr.bf16.mxu1 %v904_v42  ;;  %v471_v54 = vpop.f32.mrb[15].mxu0 }
 0x10b   : > { %v544_v55 = vadd.f32 %v887_v53, %v1206_v19  ;;  %v472_v56 = vadd.f32 %v1206_v19, %v471_v54  ;;  %v535_v57 = vpop.f32.mrb[15].mxu1  ;;  %907 = vmatpush3.bf16.msra.mxu1 %v906_v40  ;;  %v577_v60 = vmax.f32 %v541_v46, 0.0  ;;  %v559_v61 = vmax.f32 %v469_v47, 0.0 }
 0x10c   : > { %v562_v58 = vmax.f32 %v480_v52, 0.0  ;;  %v536_v59 = vadd.f32 %v1206_v19, %v535_v57  ;;  %909 = vmatprep.subr.bf16.mxu1 %v908_v39  ;;  %v575_v0 = vmax.f32 %v533_v51, 0.0  ;;  %v1080_v19 = vmov 0.0  }
 0x10d   : > { %v578_v62 = vmax.f32 %v544_v55, 0.0  ;;  %v560_v63 = vmax.f32 %v472_v56, 0.0  ;;  %201 = vst [vmem:[%s185_s11] sm:$0x1] %v1080_v19 }
 0x10e   : > { %v918_v1 = vpack.c.bf16 %v562_v58, %v561_v50  ;;  %v576_v2 = vmax.f32 %v536_v59, 0.0 }
 0x10f   : > { %v916_v3 = vpack.c.bf16 %v578_v62, %v577_v60  ;;  %v914_v4 = vpack.c.bf16 %v560_v63, %v559_v61  ;;  %911 = vmatpush3.bf16.msra.mxu1 %v910_v37 }
 0x110   : > { %v912_v5 = vpack.c.bf16 %v576_v2, %v575_v0 }
 0x112   : > { %913 = vmatprep.subr.bf16.mxu1 %v912_v5 }
 0x113   : > { %915 = vmatpush3.bf16.msra.mxu1 %v914_v4 }
 0x114   : > { %917 = vmatprep.subr.bf16.mxu1 %v916_v3  ;;  %v592_v7 = vld [vmem:[%s185_s11] sm:$0x1] }
 0x117   : > { %919 = vmatpush3.bf16.msra.mxu1 %v918_v1 }
 0x11a   : > { %658 = vmatmul.mubr.f32.vlgmr.msra.gmra.mrb[16].mxu1 %v1079_v18 }
 0x1ed   : > { %v849_v6 = vpop.f32.mrb[16].mxu1 }
 0x1ee   : > { %v850_v8 = vpop.f32.mrb[17].mxu1 }
 0x1ef   : > { %v851_v9 = vadd.f32 %v850_v8, %v849_v6 }
 0x1f1   : > { %v663_v10 = vadd.f32 %v851_v9, %v592_v7 }
 0x1f3   : > { %664 = vst [vmem:[%s185_s11] sm:$0x1] %v663_v10 }
 0x1fa   : > { %v668_v11 = vld [vmem:[%s185_s11] sm:$0x1] }
 0x1fb   : > { %v669_v12 = vmul.f32 0.00390625, %v668_v11 }
 0x1fd   : > { %670 = vst [vmem:[%s185_s11] sm:$0x1] %v669_v12 }
 0x1fe   : > { %1012 = shalt.err (!%p1009_p5)
}
 0x1ff   : > { %s1013_s4 = scalar_lea.hbm %s1246_s26, 16  ;;  %s1017_s7 = scalar_lea.hbm %s1296_s3, 32 }
 0x200   : > { %p1014_p6 = scmp.ne.s32.totalorder %s1246_s26, %s1013_s4  ;;  %p1018_p10 = scmp.lt.u32.totalorder %s1246_s26, %s1296_s3 }
 0x201   : > { %p1019_p11 = scmp.lt.u32.totalorder %s1017_s7, %s1013_s4  ;;  %p1021_p13 = scmp.lt.u32.totalorder %s1013_s4, %s1246_s26 }
 0x202   : > { %p1015_p7 = pnand %p1014_p6, %p1142_p4 }
 0x203   : > { %p1020_p12 = por %p1019_p11, %p1018_p10 }
 0x204   : > { %p1016_p9 = pneg %p1015_p7 }
 0x205   : > { %p1022_p0 = por %p1021_p13, %p1020_p12 }
 0x207   : > { %p1023_p1 = pnand %p1022_p0, %p1016_p9 }
 0x209   : > { %1026 = shalt.err (!%p1023_p1)
}
 0x20a   : > { %924 = dma.vmem_to_hbm [thread:$0]  (%p1142_p4), %s1248_s19, 16, %s1246_s26, %s672_s27  }
 0x20b PF: > { %p930_p2 = scmp.ge.s32.totalorder %s1077_s17, 2  ;;  %s696_s10 = sand.u32 1, %s1057_s12  }
 0x20c   : > { %s697_s11 = scalar_lea.sflag [#allocation3], %s696_s10 }
 0x20d   : > { %p927_p3 = pnand %p930_p2, %p1149_p8 }
 0x20f   : > { %1052 = dma.done.wait (!%p927_p3), %s697_s11, 16  }
 0x210   : > { %1054 = vsyncadd (!%p927_p3), %s697_s11, 4294967280  ;;  %s16_s17 = sadd.s32 1, %s1077_s17   ;;  %s1299_s12 = smov %s1061_s13 }
 0x211   : > { %p13_p5 = scmp.ge.s32.totalorder %s16_s17, 4   ;;  %s1300_s13 = smov %s1065_s14 }
 0x212   : > { %s1301_s14 = smov %s1155_s25  ;;  %s1302_s15 = smov %s1073_s16 }
 0x213   : > { %s1303_s16 = smov %s1305_s20  ;;  %15 = sbr.rel (!%p13_p5) target bundleno = 4 (0x4), region = 75 }
 0x21a   :  { %701 = vsyncpa [#allocation3], 1 }
 0x21b   :  { %703 = vsyncpa [#allocation3 + $0x1], 1 }

</bundles_post_ra>
